<compile_context>
chip_gen: v6e
topology: v6e:2x2x1
jax: 0.10.0
libtpu: 0.0.40
codegen_flags: <defaults>
</compile_context>

<pallas_src>
import functools

import jax
import jax.numpy as jnp
from jax.experimental import pallas as pl
from jax.experimental.pallas import tpu as pltpu


def ensemble_kernel(xt_ref, w_ref, b_ref, out_ref, *, num_models, num_classes):
    # xt_ref : (D, TB)    bf16  -- batch tile, samples on the lane axis
    # w_ref  : (M*C, D)   bf16  -- all models' class rows stacked
    # b_ref  : (M*C, 1)   f32
    # out_ref: (1, TB)    int32 -- lane-dense majority-vote labels
    M = num_models
    C = num_classes
    TB = out_ref.shape[-1]

    # One MXU matmul for every model at once; f32 accumulation, f32 bias add.
    logits = jnp.dot(w_ref[...], xt_ref[...],
                     preferred_element_type=jnp.float32) + b_ref[...]     # (M*C, TB)

    cls = jax.lax.broadcasted_iota(jnp.int32, (C, TB), 0)                 # (C, TB)

    # Vote histogram kept entirely in vregs (no scratch, no RMW stores).
    votes = jnp.zeros((C, TB), jnp.int32)
    for m in range(M):                       # static unroll, M is small
        seg = logits[m * C:(m + 1) * C, :]                                # (C, TB)
        mx = jnp.max(seg, axis=0, keepdims=True)                          # (1, TB)
        # First-index argmax over the (sublane) class axis.  The masked-min
        # idiom is used because it lowers cleanly on Mosaic for all chips.
        pred = jnp.min(jnp.where(seg == mx, cls, C), axis=0, keepdims=True)
        votes = votes + (cls == pred).astype(jnp.int32)

    best = jnp.max(votes, axis=0, keepdims=True)                          # (1, TB)
    # torch.mode tie-break: smallest modal value (= smallest class index).
    majority = jnp.min(jnp.where(votes == best, cls, C), axis=0, keepdims=True)
    out_ref[...] = majority.astype(jnp.int32)                             # lane-dense store


def majority_vote_ensemble(x, W, b, *, batch_tile=512):
    B, D = x.shape
    M, _, C = W.shape

    # Wrapper-side layout plumbing: samples -> lanes, all model/class rows
    # stacked so one matmul computes every logit.  bf16 inputs for the MXU.
    xt = x.T.astype(jnp.bfloat16)                                   # (D, B)
    w2 = jnp.transpose(W, (0, 2, 1)).reshape(M * C, D).astype(jnp.bfloat16)
    b2 = b.reshape(M * C, 1).astype(jnp.float32)

    TB = B if (B <= batch_tile or B % batch_tile != 0) else batch_tile
    grid = (B // TB,)

    kernel = functools.partial(ensemble_kernel, num_models=M, num_classes=C)

    out = pl.pallas_call(
        kernel,
        out_shape=jax.ShapeDtypeStruct((1, B), jnp.int32),
        grid_spec=pltpu.PrefetchScalarGridSpec(
            num_scalar_prefetch=0,
            grid=grid,
            in_specs=[
                pl.BlockSpec((D, TB), lambda i: (0, i)),      # x^T batch tile
                pl.BlockSpec((M * C, D), lambda i: (0, 0)),   # all weights (resident)
                pl.BlockSpec((M * C, 1), lambda i: (0, 0)),   # all biases (resident)
            ],
            out_specs=pl.BlockSpec((1, TB), lambda i: (0, i)),
        ),
        compiler_params=pltpu.CompilerParams(
            dimension_semantics=("parallel",),        # shard batch tiles across TCs
            vmem_limit_bytes=32 * 1024 * 1024,        # explicit budget (v7x-safe)
        ),
    )(xt, w2, b2)
    return out[0]


def reference(x, W, b):
    # Pure-JAX reference mirroring the PyTorch ensemble semantics, using the
    # same bf16 operands / f32 accumulation as the kernel.
    xb = x.astype(jnp.bfloat16)
    Wb = W.astype(jnp.bfloat16)
    logits = jnp.einsum("bd,mdc->mbc", xb, Wb,
                        preferred_element_type=jnp.float32) + b[:, None, :]  # (M, B, C)
    preds = jnp.argmax(logits, axis=-1).T                                    # (B, M)
    C = W.shape[-1]
    onehot = (preds[:, :, None] == jnp.arange(C)[None, None, :]).astype(jnp.int32)
    counts = onehot.sum(axis=1)                                              # (B, C)
    return jnp.argmax(counts, axis=-1).astype(jnp.int32)   # mode, smallest on ties


if __name__ == "__main__":
    B, D, C, M = 8, 32, 16, 5

    key = jax.random.PRNGKey(0)
    kx, kw, kb = jax.random.split(key, 3)
    x = jax.random.normal(kx, (B, D), dtype=jnp.float32)
    W = jax.random.normal(kw, (M, D, C), dtype=jnp.float32) * 0.1
    b = jax.random.normal(kb, (M, C), dtype=jnp.float32) * 0.1

    out = majority_vote_ensemble(x, W, b)
    jax.block_until_ready(out)

    ref = reference(x, W, b)
    assert out.shape == (B,), out.shape
    assert bool(jnp.all(out == ref)), (out, ref)

    print("KERNEL_OK")
</pallas_src>

<mosaic_0001>
module attributes {stable_mosaic.version = 11 : i64} {
  func.func @ensemble_kernel(%arg0: i32, %arg1: memref<32x8xbf16, #tpu.memory_space<vmem>>, %arg2: memref<80x32xbf16, #tpu.memory_space<vmem>>, %arg3: memref<80x1xf32, #tpu.memory_space<vmem>>, %arg4: memref<1x8xi32, #tpu.memory_space<vmem>>) attributes {dimension_semantics = [#tpu.dimension_semantics<parallel>], iteration_bounds = array<i64: 1>, scalar_prefetch = 0 : i64, scratch_operands = 0 : i64, tpu.core_type = #tpu.core_type<tc>, window_params = [{transform_indices = @transform_0, window_bounds = array<i64: 32, 8>}, {pipeline_mode = #tpu.pipeline_mode<synchronous>, transform_indices = @transform_1, window_bounds = array<i64: 80, 32>}, {pipeline_mode = #tpu.pipeline_mode<synchronous>, transform_indices = @transform_2, window_bounds = array<i64: 80, 1>}, {transform_indices = @transform_3, window_bounds = array<i64: 1, 8>}]} {
    %c0 = arith.constant 0 : index
    %c0_0 = arith.constant 0 : index
    %0 = vector.load %arg2[%c0, %c0_0] : memref<80x32xbf16, #tpu.memory_space<vmem>>, vector<80x32xbf16>
    %c0_1 = arith.constant 0 : index
    %c0_2 = arith.constant 0 : index
    %1 = vector.load %arg1[%c0_1, %c0_2] : memref<32x8xbf16, #tpu.memory_space<vmem>>, vector<32x8xbf16>
    %cst = arith.constant dense<0.000000e+00> : vector<80x8xf32>
    %2 = tpu.matmul %0, %1, %cst {dimension_numbers = #tpu.dot_dimension_numbers<[1], [0], [0], [1], [0, 0, 1, 1], [], []>} : vector<80x32xbf16>, vector<32x8xbf16>, vector<80x8xf32> -> vector<80x8xf32>
    %c0_3 = arith.constant 0 : index
    %c0_4 = arith.constant 0 : index
    %3 = vector.load %arg3[%c0_3, %c0_4] : memref<80x1xf32, #tpu.memory_space<vmem>>, vector<80x1xf32>
    %4 = vector.broadcast %3 : vector<80x1xf32> to vector<80x8xf32>
    %5 = arith.addf %2, %4 : vector<80x8xf32>
    %6 = tpu.iota {dimensions = array<i32: 0>} : vector<16x8xi32>
    %c0_i32 = arith.constant 0 : i32
    %7 = vector.broadcast %c0_i32 : i32 to vector<16x8xi32>
    %8 = vector.extract_strided_slice %5 {offsets = [0, 0], sizes = [16, 8], strides = [1, 1]} : vector<80x8xf32> to vector<16x8xf32>
    %cst_5 = arith.constant dense<0xFF800000> : vector<8xf32>
    %9 = vector.multi_reduction <maximumf>, %8, %cst_5 [0] : vector<16x8xf32> to vector<8xf32>
    %10 = vector.shape_cast %9 : vector<8xf32> to vector<1x8xf32>
    %11 = vector.broadcast %10 : vector<1x8xf32> to vector<16x8xf32>
    %12 = arith.cmpf oeq, %8, %11 : vector<16x8xf32>
    %c16_i32 = arith.constant 16 : i32
    %13 = vector.broadcast %c16_i32 : i32 to vector<16x8xi32>
    %14 = arith.select %12, %6, %13 : vector<16x8xi1>, vector<16x8xi32>
    %cst_6 = arith.constant dense<2147483647> : vector<8xi32>
    %15 = vector.multi_reduction <minsi>, %14, %cst_6 [0] : vector<16x8xi32> to vector<8xi32>
    %16 = vector.shape_cast %15 : vector<8xi32> to vector<1x8xi32>
    %17 = vector.broadcast %16 : vector<1x8xi32> to vector<16x8xi32>
    %18 = arith.cmpi eq, %6, %17 : vector<16x8xi32>
    %19 = arith.extui %18 : vector<16x8xi1> to vector<16x8xi32>
    %20 = arith.addi %7, %19 : vector<16x8xi32>
    %21 = vector.extract_strided_slice %5 {offsets = [16, 0], sizes = [16, 8], strides = [1, 1]} : vector<80x8xf32> to vector<16x8xf32>
    %cst_7 = arith.constant dense<0xFF800000> : vector<8xf32>
    %22 = vector.multi_reduction <maximumf>, %21, %cst_7 [0] : vector<16x8xf32> to vector<8xf32>
    %23 = vector.shape_cast %22 : vector<8xf32> to vector<1x8xf32>
    %24 = vector.broadcast %23 : vector<1x8xf32> to vector<16x8xf32>
    %25 = arith.cmpf oeq, %21, %24 : vector<16x8xf32>
    %c16_i32_8 = arith.constant 16 : i32
    %26 = vector.broadcast %c16_i32_8 : i32 to vector<16x8xi32>
    %27 = arith.select %25, %6, %26 : vector<16x8xi1>, vector<16x8xi32>
    %cst_9 = arith.constant dense<2147483647> : vector<8xi32>
    %28 = vector.multi_reduction <minsi>, %27, %cst_9 [0] : vector<16x8xi32> to vector<8xi32>
    %29 = vector.shape_cast %28 : vector<8xi32> to vector<1x8xi32>
    %30 = vector.broadcast %29 : vector<1x8xi32> to vector<16x8xi32>
    %31 = arith.cmpi eq, %6, %30 : vector<16x8xi32>
    %32 = arith.extui %31 : vector<16x8xi1> to vector<16x8xi32>
    %33 = arith.addi %20, %32 : vector<16x8xi32>
    %34 = vector.extract_strided_slice %5 {offsets = [32, 0], sizes = [16, 8], strides = [1, 1]} : vector<80x8xf32> to vector<16x8xf32>
    %cst_10 = arith.constant dense<0xFF800000> : vector<8xf32>
    %35 = vector.multi_reduction <maximumf>, %34, %cst_10 [0] : vector<16x8xf32> to vector<8xf32>
    %36 = vector.shape_cast %35 : vector<8xf32> to vector<1x8xf32>
    %37 = vector.broadcast %36 : vector<1x8xf32> to vector<16x8xf32>
    %38 = arith.cmpf oeq, %34, %37 : vector<16x8xf32>
    %c16_i32_11 = arith.constant 16 : i32
    %39 = vector.broadcast %c16_i32_11 : i32 to vector<16x8xi32>
    %40 = arith.select %38, %6, %39 : vector<16x8xi1>, vector<16x8xi32>
    %cst_12 = arith.constant dense<2147483647> : vector<8xi32>
    %41 = vector.multi_reduction <minsi>, %40, %cst_12 [0] : vector<16x8xi32> to vector<8xi32>
    %42 = vector.shape_cast %41 : vector<8xi32> to vector<1x8xi32>
    %43 = vector.broadcast %42 : vector<1x8xi32> to vector<16x8xi32>
    %44 = arith.cmpi eq, %6, %43 : vector<16x8xi32>
    %45 = arith.extui %44 : vector<16x8xi1> to vector<16x8xi32>
    %46 = arith.addi %33, %45 : vector<16x8xi32>
    %47 = vector.extract_strided_slice %5 {offsets = [48, 0], sizes = [16, 8], strides = [1, 1]} : vector<80x8xf32> to vector<16x8xf32>
    %cst_13 = arith.constant dense<0xFF800000> : vector<8xf32>
    %48 = vector.multi_reduction <maximumf>, %47, %cst_13 [0] : vector<16x8xf32> to vector<8xf32>
    %49 = vector.shape_cast %48 : vector<8xf32> to vector<1x8xf32>
    %50 = vector.broadcast %49 : vector<1x8xf32> to vector<16x8xf32>
    %51 = arith.cmpf oeq, %47, %50 : vector<16x8xf32>
    %c16_i32_14 = arith.constant 16 : i32
    %52 = vector.broadcast %c16_i32_14 : i32 to vector<16x8xi32>
    %53 = arith.select %51, %6, %52 : vector<16x8xi1>, vector<16x8xi32>
    %cst_15 = arith.constant dense<2147483647> : vector<8xi32>
    %54 = vector.multi_reduction <minsi>, %53, %cst_15 [0] : vector<16x8xi32> to vector<8xi32>
    %55 = vector.shape_cast %54 : vector<8xi32> to vector<1x8xi32>
    %56 = vector.broadcast %55 : vector<1x8xi32> to vector<16x8xi32>
    %57 = arith.cmpi eq, %6, %56 : vector<16x8xi32>
    %58 = arith.extui %57 : vector<16x8xi1> to vector<16x8xi32>
    %59 = arith.addi %46, %58 : vector<16x8xi32>
    %60 = vector.extract_strided_slice %5 {offsets = [64, 0], sizes = [16, 8], strides = [1, 1]} : vector<80x8xf32> to vector<16x8xf32>
    %cst_16 = arith.constant dense<0xFF800000> : vector<8xf32>
    %61 = vector.multi_reduction <maximumf>, %60, %cst_16 [0] : vector<16x8xf32> to vector<8xf32>
    %62 = vector.shape_cast %61 : vector<8xf32> to vector<1x8xf32>
    %63 = vector.broadcast %62 : vector<1x8xf32> to vector<16x8xf32>
    %64 = arith.cmpf oeq, %60, %63 : vector<16x8xf32>
    %c16_i32_17 = arith.constant 16 : i32
    %65 = vector.broadcast %c16_i32_17 : i32 to vector<16x8xi32>
    %66 = arith.select %64, %6, %65 : vector<16x8xi1>, vector<16x8xi32>
    %cst_18 = arith.constant dense<2147483647> : vector<8xi32>
    %67 = vector.multi_reduction <minsi>, %66, %cst_18 [0] : vector<16x8xi32> to vector<8xi32>
    %68 = vector.shape_cast %67 : vector<8xi32> to vector<1x8xi32>
    %69 = vector.broadcast %68 : vector<1x8xi32> to vector<16x8xi32>
    %70 = arith.cmpi eq, %6, %69 : vector<16x8xi32>
    %71 = arith.extui %70 : vector<16x8xi1> to vector<16x8xi32>
    %72 = arith.addi %59, %71 : vector<16x8xi32>
    %cst_19 = arith.constant dense<-2147483648> : vector<8xi32>
    %73 = vector.multi_reduction <maxsi>, %72, %cst_19 [0] : vector<16x8xi32> to vector<8xi32>
    %74 = vector.shape_cast %73 : vector<8xi32> to vector<1x8xi32>
    %75 = vector.broadcast %74 : vector<1x8xi32> to vector<16x8xi32>
    %76 = arith.cmpi eq, %72, %75 : vector<16x8xi32>
    %c16_i32_20 = arith.constant 16 : i32
    %77 = vector.broadcast %c16_i32_20 : i32 to vector<16x8xi32>
    %78 = arith.select %76, %6, %77 : vector<16x8xi1>, vector<16x8xi32>
    %cst_21 = arith.constant dense<2147483647> : vector<8xi32>
    %79 = vector.multi_reduction <minsi>, %78, %cst_21 [0] : vector<16x8xi32> to vector<8xi32>
    %80 = vector.shape_cast %79 : vector<8xi32> to vector<1x8xi32>
    %c0_22 = arith.constant 0 : index
    %c0_23 = arith.constant 0 : index
    %81 = vector.load %arg4[%c0_22, %c0_23] : memref<1x8xi32, #tpu.memory_space<vmem>>, vector<1x8xi32>
    tpu.vector_store %arg4[%c0_22, %c0_23], %80 {strides = array<i32>} : memref<1x8xi32, #tpu.memory_space<vmem>>, vector<1x8xi32>,
    return
  }
  func.func @transform_0(%arg0: i32) -> (i32, i32) {
    %c0_i32 = arith.constant 0 : i32
    %c0_i32_0 = arith.constant 0 : i32
    return %c0_i32, %arg0 : i32, i32
  }
  func.func @transform_1(%arg0: i32) -> (i32, i32) {
    %c0_i32 = arith.constant 0 : i32
    %c0_i32_0 = arith.constant 0 : i32
    %c0_i32_1 = arith.constant 0 : i32
    return %c0_i32, %c0_i32_0 : i32, i32
  }
  func.func @transform_2(%arg0: i32) -> (i32, i32) {
    %c0_i32 = arith.constant 0 : i32
    %c0_i32_0 = arith.constant 0 : i32
    %c0_i32_1 = arith.constant 0 : i32
    return %c0_i32, %c0_i32_0 : i32, i32
  }
  func.func @transform_3(%arg0: i32) -> (i32, i32) {
    %c0_i32 = arith.constant 0 : i32
    %c0_i32_0 = arith.constant 0 : i32
    return %c0_i32, %arg0 : i32, i32
  }
}

</mosaic_0001>

<bundles_post_ra>
// kernel: tpu_custom_call.1
= control target key start
LH: loop header
LB: loop body
LE: loop exit
PB: predicated region body
PF: predicated region fallthrough
CT: control target
= control target key end

     0   :  { %v506_v1 = vmov 0.0   ;;  %vm507_vm0 = vmmov 0   ;;  %v508_v5 = vmov 0   ;;  %vm127_vm1 = vcmask 261120   ;;  %s687_s0 = inlined_call_operand.vmem [shape: bf16[32,8], index: 0, kind: input, shape index: {}]   ;;  %s688_s1 = inlined_call_operand.vmem [shape: bf16[80,32], index: 1, kind: input, shape index: {}]   ;;  %s689_s2 = inlined_call_operand.vmem [shape: f32[80,1], index: 2, kind: input, shape index: {}]   ;;  %s690_s3 = inlined_call_operand.hbm [shape: s32[1,8], index: 3, kind: output, shape index: {}]  }
   0x1   :  { %v477_v0 = vld [vmem:[%s687_s0 + $0x8] sm:$0xff]   ;;  %443 = vmatprep.subr.bf16.mxu0 %v506_v1  ;;  %467 = vmatprep.subr.bf16.mxu1 %v506_v1  ;;  %v478_v2 = vld [vmem:[%s687_s0] sm:$0xff]   ;;  %v480_v4 = vld [vmem:[%s688_s1 + $0x18] sm:$0xff]  }
   0x2   :  { %444 = vmatpush3.bf16.msra.mxu0 %v477_v0  ;;  %469 = vmatpush3.bf16.msra.mxu1 %v477_v0  ;;  %v479_v3 = vld [vmem:[%s688_s1] sm:$0xff]   ;;  %v32_v6 = vld [vmem:[%s689_s2 + $0x10] sm:$0xff]  ;;  %v33_v8 = vld [vmem:[%s689_s2 + $0x18] sm:$0xff] }
   0x3   :  { %445 = vmatprep.subr.bf16.mxu0 %v506_v1  ;;  %468 = vmatprep.subr.bf16.mxu1 %v506_v1  ;;  %v30_v7 = vld [vmem:[%s689_s2] sm:$0xff]  ;;  %v31_v9 = vld [vmem:[%s689_s2 + $0x8] sm:$0xff] }
   0x4   :  { %447 = vmatprep.mubr.msk.bf16.mxu0 %vm507_vm0, %v506_v1  ;;  %459 = vmatprep.mubr.msk.bf16.mxu1 %vm507_vm0, %v506_v1 }
   0x5   :  { %476 = vset.pattern.permute.xlu1 %v508_v5  ;;  %475 = vset.pattern.permute.xlu0 %v508_v5 }
   0x6   :  { %446 = vmatpush3.bf16.msra.mxu0 %v478_v2  ;;  %470 = vmatpush3.bf16.msra.mxu1 %v478_v2 }
   0x7   :  { %52 = vperm.xlu1 %476, %v32_v6   ;;  %42 = vperm.xlu0 %475, %v30_v7  }
   0x9   :  { %448 = vmatmul.mubr.msk.bf16.vlgmr.msra.gmra.mxu0 %vm127_vm1, %v479_v3  ;;  %460 = vmatmul.mubr.msk.bf16.vlgmr.msra.gmra.mxu1 %vm127_vm1, %v480_v4 }
   0xa   :  { %451 = vmatprep.mubr.msk.bf16.mxu0 %vm507_vm0, %v506_v1  ;;  %463 = vmatprep.mubr.msk.bf16.mxu1 %vm507_vm0, %v506_v1 }
   0xb   :  { %8 = vsyncpa [#allocation3], 0  ;;  %v481_v10 = vld [vmem:[%s688_s1 + $0x8] sm:$0xff]   ;;  %57 = vperm.xlu1 %476, %v33_v8   ;;  %47 = vperm.xlu0 %475, %v31_v9   ;;  %v482_v11 = vld [vmem:[%s688_s1 + $0x20] sm:$0xff]   ;;  %vm219_vm2 = vcmask 64512   ;;  %v216_v48 = vlaneseq }
   0xc   :  { %v35_v12 = vld [vmem:[%s689_s2 + $0x28] sm:$0xff]  ;;  %v34_v13 = vld [vmem:[%s689_s2 + $0x20] sm:$0xff]  ;;  %v37_v14 = vld [vmem:[%s689_s2 + $0x38] sm:$0xff] }
   0xd   :  { %v36_v15 = vld [vmem:[%s689_s2 + $0x30] sm:$0xff]  ;;  %v39_v17 = vld [vmem:[%s689_s2 + $0x48] sm:$0xff]  ;;  %v38_v18 = vld [vmem:[%s689_s2 + $0x40] sm:$0xff]  ;;  %v612_v62 = vshrl.u32 %v216_v48, 7 }
   0xe   :  { %v483_v16 = vld [vmem:[%s688_s1 + $0x10] sm:$0xff]   ;;  %s509_s1 = smov [#allocation2]  }
   0xf   :  { %67 = vperm.xlu1 %476, %v35_v12   ;;  %62 = vperm.xlu0 %475, %v34_v13   ;;  %s416_s2 = sshll.u32 %s509_s1, 4  ;;  %s417_s2 = int_to_ptr.vmem [resolvable:$true] %s416_s2 }
  0x10   :  { %s484_s18 = scalar_lea.vmem %s417_s2, 16  ;;  %s488_s19 = scalar_lea.vmem %s417_s2, 32 }
  0x11   :  { %452 = vmatmul.mubr.msk.bf16.gmra.mxu0 %vm127_vm1, %v481_v10  ;;  %464 = vmatmul.mubr.msk.bf16.gmra.mxu1 %vm127_vm1, %v482_v11  ;;  %p485_p0 = scmp.ne.s32.totalorder %s417_s2, %s484_s18  ;;  %p489_p1 = scmp.lt.s32.totalorder %s417_s2, %s417_s2 }
  0x12   :  { %455 = vmatprep.mubr.msk.bf16.mxu0 %vm507_vm0, %v506_v1  ;;  %p490_p2 = scmp.lt.s32.totalorder %s488_s19, %s484_s18 }
  0x13   :  { %77 = vperm.xlu1 %476, %v37_v14   ;;  %72 = vperm.xlu0 %475, %v36_v15  }
  0x14   :  { %p491_p3 = por %p490_p2, %p489_p1 }
  0x16   :  { %p492_p4 = pnand %p491_p3, %p485_p0 }
  0x17   :  { %87 = vperm.xlu1 %476, %v39_v17   ;;  %82 = vperm.xlu0 %475, %v38_v18   ;;  %v623_v18 = vadd.s32 8, %v612_v62 }
  0x19   :  { %456 = vmatmul.mubr.msk.bf16.gmra.mxu0 %vm127_vm1, %v483_v16 }
  0x82   :  { %v43_v19 = vpop.permute.xlu0 %42  ;;  %v53_v20 = vpop.permute.xlu1 %52 }
  0x86   :  { %v48_v21 = vpop.permute.xlu0 %47  ;;  %v58_v22 = vpop.permute.xlu1 %57 }
  0x8a   :  { %v593_v23 = vpop.permute.xlu0 %62  ;;  %v595_v24 = vpop.permute.xlu1 %67 }
  0x8e   :  { %v73_v25 = vpop.permute.xlu0 %72  ;;  %v78_v28 = vpop.permute.xlu1 %77 }
  0x92   :  { %v83_v43 = vpop.permute.xlu0 %82  ;;  %v88_v53 = vpop.permute.xlu1 %87 }
  0xc9   :  { %v177_v26 = vpop.f32.mrf.mxu0  ;;  %v201_v27 = vpop.f32.mrf.mxu1 }
  0xca   :  { %v597_v29 = vadd.f32 %v201_v27, %v73_v25  ;;  %v178_v32 = vadd.f32 %v177_v26, %v43_v19 }
  0xcb   :  { %v449_v30 = vpop.f32.mrf.mxu0  ;;  %v461_v31 = vpop.f32.mrf.mxu1 }
  0xcc   :  { %v314_v35 = vsel %vm219_vm2, %v597_v29, -inf  ;;  %v220_v40 = vsel %vm219_vm2, %v178_v32, -inf }
  0xcd   :  { %v180_v33 = vpop.f32.mrf.mxu0  ;;  %v204_v34 = vpop.f32.mrf.mxu1 }
  0xce   :  { %v181_v36 = vadd.f32 %v180_v33, %v48_v21  ;;  %v205_v37 = vadd.f32 %v204_v34, %v78_v28 }
  0xcf   :  { %v450_v38 = vpop.f32.mrf.mxu0  ;;  %v462_v39 = vpop.f32.mrf.mxu1 }
  0xd0   :  { %v221_v41 = vsel %vm219_vm2, %v181_v36, -inf  ;;  %v315_v42 = vsel %vm219_vm2, %v205_v37, -inf }
  0xd1   :  { %v222_v44 = vmax.f32 %v220_v40, %v221_v41  ;;  %v316_v45 = vmax.f32 %v314_v35, %v315_v42  ;;  %v185_v46 = vpop.f32.mrf.mxu0  ;;  %v209_v47 = vpop.f32.mrf.mxu1 }
  0xd2   :  { %v604_v54 = vadd.f32 %v185_v46, %v53_v20  ;;  %v606_v55 = vadd.f32 %v209_v47, %v83_v43 }
  0xd3   :  { %v223_v49 = vrot.slane %v222_v44, 4  ;;  %v317_v50 = vrot.slane %v316_v45, 4  ;;  %v453_v51 = vpop.f32.mrf.mxu0  ;;  %v465_v52 = vpop.f32.mrf.mxu1 }
  0xd4   :  { %v250_v3 = vsel %vm219_vm2, %v604_v54, -inf  ;;  %v346_v4 = vsel %vm219_vm2, %v606_v55, -inf }
  0xd5   :  { %v224_v56 = vmax.f32 %v222_v44, %v223_v49  ;;  %v318_v57 = vmax.f32 %v316_v45, %v317_v50  ;;  %v188_v58 = vpop.f32.mrf.mxu0  ;;  %v212_v59 = vpop.f32.mrf.mxu1 }
  0xd6   :  { %v608_v60 = vadd.f32 %v188_v58, %v58_v22  ;;  %v610_v61 = vadd.f32 %v212_v59, %v88_v53 }
  0xd7   :  { %v225_v63 = vrot.slane %v224_v56, 2  ;;  %v319_v0 = vrot.slane %v318_v57, 2  ;;  %v454_v1 = vpop.f32.mrf.mxu0  ;;  %v466_v2 = vpop.f32.mrf.mxu1 }
  0xd8   :  { %v251_v6 = vsel %vm219_vm2, %v608_v60, -inf  ;;  %v347_v7 = vsel %vm219_vm2, %v610_v61, -inf }
  0xd9   :  { %v226_v8 = vmax.f32 %v224_v56, %v225_v63  ;;  %v320_v9 = vmax.f32 %v318_v57, %v319_v0  ;;  %v252_v10 = vmax.f32 %v250_v3, %v251_v6  ;;  %v348_v11 = vmax.f32 %v346_v4, %v347_v7  ;;  %v193_v12 = vpop.f32.mrf.mxu0 }
  0xdb   :  { %v227_v13 = vrot.slane %v226_v8, 1  ;;  %v321_v14 = vrot.slane %v320_v9, 1  ;;  %v253_v15 = vrot.slane %v252_v10, 4  ;;  %v349_v16 = vrot.slane %v348_v11, 4  ;;  %v457_v17 = vpop.f32.mrf.mxu0 }
  0xdd   :  { %v228_v19 = vmax.f32 %v226_v8, %v227_v13  ;;  %v322_v20 = vmax.f32 %v320_v9, %v321_v14  ;;  %v196_v21 = vpop.f32.mrf.mxu0  ;;  %v254_v22 = vmax.f32 %v252_v10, %v253_v15  ;;  %v350_v25 = vmax.f32 %v348_v11, %v349_v16 }
  0xde   :  { %v630_v31 = vadd.f32 %v196_v21, %v595_v24 }
  0xdf   :  { %vm229_vm3 = vcmp.eq.f32.partialorder %v178_v32, %v228_v19  ;;  %vm230_vm4 = vcmp.eq.f32.partialorder %v181_v36, %v228_v19  ;;  %vm323_vm5 = vcmp.eq.f32.partialorder %v597_v29, %v322_v20  ;;  %vm324_vm6 = vcmp.eq.f32.partialorder %v205_v37, %v322_v20  ;;  %v458_v26 = vpop.f32.mrf.mxu0 }
  0xe0   :  { %v231_v27 = vsel %vm229_vm3, %v612_v62, 16  ;;  %v232_v28 = vsel %vm230_vm4, %v623_v18, 16  ;;  %v325_v30 = vsel %vm323_vm5, %v612_v62, 16  ;;  %v326_v32 = vsel %vm324_vm6, %v623_v18, 16 }
  0xe1   :  { %v233_v33 = vsel %vm219_vm2, %v231_v27, 2147483647  ;;  %v234_v34 = vsel %vm219_vm2, %v232_v28, 2147483647  ;;  %v255_v35 = vrot.slane %v254_v22, 2  ;;  %v351_v36 = vrot.slane %v350_v25, 2 }
  0xe2   :  { %v194_v29 = vadd.f32 %v193_v12, %v593_v23  ;;  %vm235_vm7 = vcmp.lt.s32.totalorder %v233_v33, %v234_v34  ;;  %v327_v37 = vsel %vm219_vm2, %v325_v30, 2147483647  ;;  %v328_v38 = vsel %vm219_vm2, %v326_v32, 2147483647 }
  0xe3   :  { %v256_v39 = vmax.f32 %v254_v22, %v255_v35  ;;  %v352_v40 = vmax.f32 %v350_v25, %v351_v36  ;;  %v283_v24 = vsel %vm219_vm2, %v630_v31, -inf  ;;  %v236_v41 = vsel %vm235_vm7, %v233_v33, %v234_v34 }
  0xe4   :  { %v282_v44 = vsel %vm219_vm2, %v194_v29, -inf  ;;  %vm329_vm8 = vcmp.lt.s32.totalorder %v327_v37, %v328_v38  ;;  %v237_v23 = vrot.slane %v236_v41, 4 }
  0xe5   :  { %v257_v42 = vrot.slane %v256_v39, 1  ;;  %v353_v43 = vrot.slane %v352_v40, 1  ;;  %v284_v45 = vmax.f32 %v282_v44, %v283_v24  ;;  %v330_v48 = vsel %vm329_vm8, %v327_v37, %v328_v38 }
  0xe6   :  { %v331_v56 = vrot.slane %v330_v48, 4  ;;  %vm238_vm14 = vcmp.lt.s32.totalorder %v236_v41, %v237_v23 }
  0xe7   :  { %v258_v46 = vmax.f32 %v256_v39, %v257_v42  ;;  %v354_v47 = vmax.f32 %v352_v40, %v353_v43  ;;  %v285_v51 = vrot.slane %v284_v45, 4  ;;  %v239_v0 = vsel %vm238_vm14, %v236_v41, %v237_v23 }
  0xe8   :  { %vm332_vm0 = vcmp.lt.s32.totalorder %v330_v48, %v331_v56  ;;  %v240_v4 = vrot.slane %v239_v0, 2 }
  0xe9   :  { %vm259_vm9 = vcmp.eq.f32.partialorder %v604_v54, %v258_v46  ;;  %vm260_vm10 = vcmp.eq.f32.partialorder %v608_v60, %v258_v46  ;;  %vm355_vm11 = vcmp.eq.f32.partialorder %v606_v55, %v354_v47  ;;  %vm356_vm13 = vcmp.eq.f32.partialorder %v610_v61, %v354_v47 }
  0xea   :  { %v261_v49 = vsel %vm259_vm9, %v612_v62, 16  ;;  %v262_v50 = vsel %vm260_vm10, %v623_v18, 16  ;;  %v357_v57 = vsel %vm355_vm11, %v612_v62, 16  ;;  %v358_v58 = vsel %vm356_vm13, %v623_v18, 16 }
  0xeb   :  { %v263_v52 = vsel %vm219_vm2, %v261_v49, 2147483647  ;;  %v264_v53 = vsel %vm219_vm2, %v262_v50, 2147483647  ;;  %v359_v55 = vsel %vm219_vm2, %v357_v57, 2147483647  ;;  %v286_v63 = vmax.f32 %v284_v45, %v285_v51 }
  0xec   :  { %vm265_vm12 = vcmp.lt.s32.totalorder %v263_v52, %v264_v53  ;;  %v360_v60 = vsel %vm219_vm2, %v358_v58, 2147483647  ;;  %v333_v7 = vsel %vm332_vm0, %v330_v48, %v331_v56  ;;  %vm241_vm5 = vcmp.lt.s32.totalorder %v239_v0, %v240_v4 }
  0xed   :  { %v266_v54 = vsel %vm265_vm12, %v263_v52, %v264_v53  ;;  %vm361_vm15 = vcmp.lt.s32.totalorder %v359_v55, %v360_v60  ;;  %v287_v61 = vrot.slane %v286_v63, 2  ;;  %v334_v10 = vrot.slane %v333_v7, 2 }
  0xee   :  { %v267_v59 = vrot.slane %v266_v54, 4  ;;  %v362_v1 = vsel %vm361_vm15, %v359_v55, %v360_v60  ;;  %v242_v14 = vsel %vm241_vm5, %v239_v0, %v240_v4 }
  0xef   :  { %v363_v3 = vrot.slane %v362_v1, 4  ;;  %v288_v8 = vmax.f32 %v286_v63, %v287_v61  ;;  %vm335_vm8 = vcmp.lt.s32.totalorder %v333_v7, %v334_v10  ;;  %v243_v21 = vrot.slane %v242_v14, 1 }
  0xf0   :  { %vm268_vm1 = vcmp.lt.s32.totalorder %v266_v54, %v267_v59  ;;  %v336_v25 = vsel %vm335_vm8, %v333_v7, %v334_v10 }
  0xf1   :  { %v269_v2 = vsel %vm268_vm1, %v266_v54, %v267_v59  ;;  %vm364_vm3 = vcmp.lt.s32.totalorder %v362_v1, %v363_v3  ;;  %v289_v9 = vrot.slane %v288_v8, 1  ;;  %vm244_vm12 = vcmp.lt.s32.totalorder %v242_v14, %v243_v21 }
  0xf2   :  { %v270_v6 = vrot.slane %v269_v2, 2  ;;  %v365_v11 = vsel %vm364_vm3, %v362_v1, %v363_v3  ;;  %v337_v28 = vrot.slane %v336_v25, 1  ;;  %v245_v34 = vsel %vm244_vm12, %v242_v14, %v243_v21 }
  0xf3   :  { %v290_v12 = vmax.f32 %v288_v8, %v289_v9  ;;  %v366_v15 = vrot.slane %v365_v11, 2  ;;  %vm246_vm3 = vcmp.eq.s32.totalorder %v612_v62, %v245_v34 }
  0xf4   :  { %vm271_vm4 = vcmp.lt.s32.totalorder %v269_v2, %v270_v6  ;;  %vm338_vm14 = vcmp.lt.s32.totalorder %v336_v25, %v337_v28  ;;  %v248_v40 = vsel %vm246_vm3, 1, %v508_v5 }
  0xf5   :  { %v272_v13 = vsel %vm271_vm4, %v269_v2, %v270_v6  ;;  %vm291_vm6 = vcmp.eq.f32.partialorder %v194_v29, %v290_v12  ;;  %vm292_vm7 = vcmp.eq.f32.partialorder %v630_v31, %v290_v12  ;;  %vm367_vm9 = vcmp.lt.s32.totalorder %v365_v11, %v366_v15 }
  0xf6   :  { %v293_v16 = vsel %vm291_vm6, %v612_v62, 16  ;;  %v294_v17 = vsel %vm292_vm7, %v623_v18, 16  ;;  %v273_v19 = vrot.slane %v272_v13, 1  ;;  %v368_v30 = vsel %vm367_vm9, %v365_v11, %v366_v15 }
  0xf7   :  { %v295_v20 = vsel %vm219_vm2, %v293_v16, 2147483647  ;;  %v296_v22 = vsel %vm219_vm2, %v294_v17, 2147483647  ;;  %v369_v32 = vrot.slane %v368_v30, 1  ;;  %vm247_vm4 = vcmp.eq.s32.totalorder %v623_v18, %v245_v34 }
  0xf8   :  { %vm297_vm10 = vcmp.lt.s32.totalorder %v295_v20, %v296_v22  ;;  %vm274_vm11 = vcmp.lt.s32.totalorder %v272_v13, %v273_v19  ;;  %v339_v29 = vsel %vm338_vm14, %v336_v25, %v337_v28  ;;  %v249_v24 = vsel %vm247_vm4, 1, %v508_v5 }
  0xf9   :  { %v298_v26 = vsel %vm297_vm10, %v295_v20, %v296_v22  ;;  %v275_v31 = vsel %vm274_vm11, %v272_v13, %v273_v19  ;;  %vm370_vm5 = vcmp.lt.s32.totalorder %v368_v30, %v369_v32  ;;  %vm340_vm7 = vcmp.eq.s32.totalorder %v612_v62, %v339_v29 }
  0xfa   :  { %v299_v27 = vrot.slane %v298_v26, 4  ;;  %vm276_vm15 = vcmp.eq.s32.totalorder %v612_v62, %v275_v31  ;;  %vm277_vm0 = vcmp.eq.s32.totalorder %v623_v18, %v275_v31  ;;  %vm341_vm8 = vcmp.eq.s32.totalorder %v623_v18, %v339_v29 }
  0xfb   :  { %v278_v38 = vsel %vm276_vm15, 1, %v508_v5  ;;  %v279_v39 = vsel %vm277_vm0, 1, %v508_v5  ;;  %v371_v41 = vsel %vm370_vm5, %v368_v30, %v369_v32  ;;  %v342_v48 = vsel %vm340_vm7, 1, %v508_v5 }
  0xfc   :  { %vm300_vm13 = vcmp.lt.s32.totalorder %v298_v26, %v299_v27  ;;  %v280_v43 = vadd.s32 %v278_v38, %v248_v40  ;;  %v281_v44 = vadd.s32 %v279_v39, %v249_v24  ;;  %vm372_vm11 = vcmp.eq.s32.totalorder %v612_v62, %v371_v41 }
  0xfd   :  { %v301_v33 = vsel %vm300_vm13, %v298_v26, %v299_v27  ;;  %vm373_vm12 = vcmp.eq.s32.totalorder %v623_v18, %v371_v41  ;;  %v343_v49 = vsel %vm341_vm8, 1, %v508_v5  ;;  %v374_v52 = vsel %vm372_vm11, 1, %v508_v5 }
  0xfe   :  { %v302_v35 = vrot.slane %v301_v33, 2  ;;  %v375_v53 = vsel %vm373_vm12, 1, %v508_v5  ;;  %vm408_vm7 = vcmask 57344  }
 0x100   :  { %vm303_vm1 = vcmp.lt.s32.totalorder %v301_v33, %v302_v35 }
 0x101   :  { %v304_v36 = vsel %vm303_vm1, %v301_v33, %v302_v35 }
 0x102   :  { %v305_v37 = vrot.slane %v304_v36, 1 }
 0x104   :  { %vm306_vm6 = vcmp.lt.s32.totalorder %v304_v36, %v305_v37 }
 0x105   :  { %v307_v42 = vsel %vm306_vm6, %v304_v36, %v305_v37 }
 0x106   :  { %vm308_vm9 = vcmp.eq.s32.totalorder %v612_v62, %v307_v42  ;;  %vm309_vm10 = vcmp.eq.s32.totalorder %v623_v18, %v307_v42 }
 0x107   :  { %v310_v45 = vsel %vm308_vm9, 1, %v508_v5  ;;  %v311_v46 = vsel %vm309_vm10, 1, %v508_v5 }
 0x108   :  { %v312_v47 = vadd.s32 %v310_v45, %v280_v43  ;;  %v313_v23 = vadd.s32 %v311_v46, %v281_v44 }
 0x10a   :  { %v344_v50 = vadd.s32 %v342_v48, %v312_v47  ;;  %v345_v51 = vadd.s32 %v343_v49, %v313_v23 }
 0x10c   :  { %v376_v56 = vadd.s32 %v374_v52, %v344_v50  ;;  %v377_v57 = vadd.s32 %v375_v53, %v345_v51 }
 0x10e   :  { %v378_v54 = vsel %vm219_vm2, %v376_v56, 2147483648  ;;  %v379_v58 = vsel %vm219_vm2, %v377_v57, 2147483648 }
 0x10f   :  { %vm380_vm13 = vcmp.gt.s32.totalorder %v378_v54, %v379_v58 }
 0x110   :  { %v381_v55 = vsel %vm380_vm13, %v378_v54, %v379_v58 }
 0x111   :  { %v382_v59 = vrot.slane %v381_v55, 4 }
 0x113   :  { %vm383_vm14 = vcmp.gt.s32.totalorder %v381_v55, %v382_v59 }
 0x114   :  { %v384_v60 = vsel %vm383_vm14, %v381_v55, %v382_v59 }
 0x115   :  { %v385_v63 = vrot.slane %v384_v60, 2 }
 0x117   :  { %vm386_vm15 = vcmp.gt.s32.totalorder %v384_v60, %v385_v63 }
 0x118   :  { %v387_v0 = vsel %vm386_vm15, %v384_v60, %v385_v63 }
 0x119   :  { %v388_v1 = vrot.slane %v387_v0, 1 }
 0x11b   :  { %vm389_vm0 = vcmp.gt.s32.totalorder %v387_v0, %v388_v1 }
 0x11c   :  { %v390_v2 = vsel %vm389_vm0, %v387_v0, %v388_v1 }
 0x11d   :  { %vm391_vm1 = vcmp.eq.s32.totalorder %v376_v56, %v390_v2  ;;  %vm392_vm3 = vcmp.eq.s32.totalorder %v377_v57, %v390_v2 }
 0x11e   :  { %v393_v5 = vsel %vm391_vm1, %v612_v62, 16  ;;  %v394_v3 = vsel %vm392_vm3, %v623_v18, 16 }
 0x11f   :  { %v395_v61 = vsel %vm219_vm2, %v393_v5, 2147483647  ;;  %v396_v4 = vsel %vm219_vm2, %v394_v3, 2147483647 }
 0x120   :  { %vm397_vm4 = vcmp.lt.s32.totalorder %v395_v61, %v396_v4 }
 0x121   :  { %v398_v6 = vsel %vm397_vm4, %v395_v61, %v396_v4 }
 0x122   :  { %v399_v7 = vrot.slane %v398_v6, 4 }
 0x124   :  { %vm400_vm5 = vcmp.lt.s32.totalorder %v398_v6, %v399_v7 }
 0x125   :  { %v401_v8 = vsel %vm400_vm5, %v398_v6, %v399_v7 }
 0x126   :  { %v402_v9 = vrot.slane %v401_v8, 2 }
 0x128   :  { %vm403_vm6 = vcmp.lt.s32.totalorder %v401_v8, %v402_v9 }
 0x129   :  { %v404_v10 = vsel %vm403_vm6, %v401_v8, %v402_v9 }
 0x12a   :  { %v405_v11 = vrot.slane %v404_v10, 1 }
 0x12c   :  { %vm406_vm8 = vcmp.lt.s32.totalorder %v404_v10, %v405_v11 }
 0x12d   :  { %v407_v62 = vsel %vm406_vm8, %v404_v10, %v405_v11 }
 0x12e   :  { %409 = vst.msk [vmem:[#allocation2] sm:$0x1] %vm408_vm7, %v407_v62 }
 0x12f   :  { %495 = shalt.err (!%p492_p4)
}
 0x130   :  { %419 = dma.vmem_to_hbm [thread:$0]  %s417_s2, 16, %s690_s3, [#allocation3]  }
 0x131   :  { %504 = dma.done.wait [#allocation3], 16  }
 0x132   :  { %505 = vsyncadd [#allocation3], 4294967280 }
 0x133   :  { %423 = vsyncpa [#allocation3], 1 }

</bundles_post_ra>
